<compile_context>
chip_gen: v7x
topology: tpu7x:2x2x1
jax: 0.10.0
libtpu: 0.0.40
codegen_flags: <defaults>
</compile_context>

<pallas_src>
import jax
import jax.numpy as jnp
from jax.experimental import pallas as pl
from jax.experimental.pallas import tpu as pltpu


def _processor_kernel(mu_ref, adj_ref, w1_ref, b1_ref, w2_ref, b2_ref, out_ref):
    # mu_ref:  (TB, N, P) f32    adj_ref: (TB, N, N) f32
    # w1_ref:  (2P, 2P) bf16     b1_ref: (1, 2P) f32
    # w2_ref:  (2P, P)  bf16     b2_ref: (1, P)  f32
    tb, n, p = mu_ref.shape

    mu = mu_ref[...]                                  # (TB, N, P) f32
    adj = adj_ref[...]                                # (TB, N, N) f32

    # aggregated_neighbors[b,i] = sum_j A[b,i,j] * (mu[b,j] - mu[b,i])
    # Unrolled over j (N == 8): plain VPU broadcasts/FMAs, MXU left free for the MLP,
    # rowsum term folded into the loop.
    agg = jnp.zeros((tb, n, p), jnp.float32)
    for j in range(n):                                # static unroll, n == 8
        coeff = adj[:, :, j:j + 1]                    # (TB, N, 1)  lane-broadcast
        mu_j = mu[:, j:j + 1, :]                      # (TB, 1, P)  sublane-broadcast
        agg = agg + coeff * (mu_j - mu)

    # Per-node MLP.  (TB, N, P) -> (TB*N, P) merges leading dims only (minor dim
    # unchanged, N == sublane tile height) so it is a layout no-op; the MXU then
    # sees M = TB*N rows.
    mu2 = mu.reshape(tb * n, p)
    agg2 = agg.reshape(tb * n, p)

    # Single Linear1 matmul on the concatenated features (K = 2P) instead of two
    # K = P dots.  Cast activations to the weight dtype (bf16) only at the MXU
    # boundary; accumulate in f32.
    x = jnp.concatenate([mu2, agg2], axis=-1).astype(w1_ref.dtype)   # (TB*N, 2P)
    h = jnp.dot(x, w1_ref[...], preferred_element_type=jnp.float32) + b1_ref[...]
    h = jnp.maximum(h, 0.0)                           # ReLU inside fc

    out = (jnp.dot(h.astype(w2_ref.dtype), w2_ref[...],
                   preferred_element_type=jnp.float32) + b2_ref[...])
    out = jnp.maximum(out, 0.0)                       # outer ReLU from forward()
    out_ref[...] = out.reshape(tb, n, p).astype(out_ref.dtype)


def _choose_batch_block(B, N, P, *, vmem_budget_bytes=14 * 1024 * 1024,
                        want_multiple_grid_steps=True):
    """Largest divisor of B whose per-step VMEM footprint fits the budget.

    Uses padded (8, 128)-tile sizes (the real VMEM cost), counts double buffering
    for the pipelined operands plus the large in-kernel temporaries.  The 14 MiB
    default stays below the scoped-VMEM default on every generation (16 MiB v5e,
    32 MiB v6e/v7x) and well below v7x's 64 MiB physical per-TensorCore VMEM.
    """
    def _pad(rows, cols, itemsize):
        return (-(-rows // 8) * 8) * (-(-cols // 128) * 128) * itemsize

    mu_elem = _pad(N, P, 4)             # mu / out / agg-shaped blocks, per element
    adj_elem = _pad(N, N, 4)
    x_elem = _pad(N, 2 * P, 4)          # concat / hidden activations, per element

    pipelined = 2 * (2 * mu_elem + adj_elem)      # mu in + out, adj in; 2x buffered
    temporaries = 5 * mu_elem + 3 * x_elem        # agg, loop temps, x/h (f32+bf16), out
    per_elem = pipelined + temporaries

    cap = max(1, int(vmem_budget_bytes) // per_elem)
    if want_multiple_grid_steps and B >= 2:
        cap = min(cap, B // 2)          # grid >= 2 -> both v7x TensorCores get work
    cap = max(1, min(cap, B))
    for cand in range(cap, 0, -1):
        if B % cand == 0:
            return cand
    return 1


def processor_network(mu_v, adjacency, w1, b1, w2, b2, *, batch_block=None,
                      mxu_dtype=jnp.bfloat16):
    """mu_v: (B, N, P); adjacency: (B, N, N).
       w1: (2P, 2P) (in, out); b1: (2P,); w2: (2P, P) (in, out); b2: (P,).
       NOTE: weights must be (in, out), i.e. torch nn.Linear.weight transposed."""
    B, N, P = mu_v.shape
    assert adjacency.shape == (B, N, N)
    assert w1.shape == (2 * P, 2 * P) and b1.shape == (2 * P,)
    assert w2.shape == (2 * P, P) and b2.shape == (P,)

    tb = batch_block if batch_block is not None else _choose_batch_block(B, N, P)
    assert B % tb == 0, "batch_block must divide the batch size"

    mu_f32 = mu_v.astype(jnp.float32)
    adj_f32 = adjacency.astype(jnp.float32)      # exact; no bf16 hazard
    w1_c = w1.astype(mxu_dtype)
    w2_c = w2.astype(mxu_dtype)
    b1_2d = b1.reshape(1, 2 * P).astype(jnp.float32)
    b2_2d = b2.reshape(1, P).astype(jnp.float32)

    flops = (2 * B * N * N * P                       # neighbour aggregation
             + 2 * B * N * (2 * P) * (2 * P)         # Linear1
             + 2 * B * N * (2 * P) * P)              # Linear2
    bytes_accessed = (mu_f32.size * 4 + adj_f32.size * 4 + B * N * P * 4
                      + w1_c.size * 2 + w2_c.size * 2 + (b1.size + b2.size) * 4)

    grid = (B // tb,)
    return pl.pallas_call(
        _processor_kernel,
        out_shape=jax.ShapeDtypeStruct((B, N, P), jnp.float32),
        grid_spec=pltpu.PrefetchScalarGridSpec(
            num_scalar_prefetch=0,
            grid=grid,
            in_specs=[
                pl.BlockSpec((tb, N, P), lambda b: (b, 0, 0)),        # mu_v
                pl.BlockSpec((tb, N, N), lambda b: (b, 0, 0)),        # adjacency
                pl.BlockSpec((2 * P, 2 * P), lambda b: (0, 0)),       # w1 (bf16)
                pl.BlockSpec((1, 2 * P), lambda b: (0, 0)),           # b1
                pl.BlockSpec((2 * P, P), lambda b: (0, 0)),           # w2 (bf16)
                pl.BlockSpec((1, P), lambda b: (0, 0)),               # b2
            ],
            out_specs=pl.BlockSpec((tb, N, P), lambda b: (b, 0, 0)),
        ),
        compiler_params=pltpu.CompilerParams(
            dimension_semantics=("parallel",),
            vmem_limit_bytes=32 * 1024 * 1024),
        cost_estimate=pl.CostEstimate(
            flops=flops, transcendentals=0, bytes_accessed=bytes_accessed),
    )(mu_f32, adj_f32, w1_c, b1_2d, w2_c, b2_2d)


def processor_network_ref(mu_v, adjacency, w1, b1, w2, b2):
    """Pure-JAX f32 reference matching the PyTorch forward."""
    agg = jnp.matmul(adjacency, mu_v)
    agg = agg - jnp.sum(adjacency, axis=-1, keepdims=True) * mu_v
    x = jnp.concatenate([mu_v, agg], axis=-1)
    h = jax.nn.relu(x @ w1 + b1)
    return jax.nn.relu(h @ w2 + b2)


if __name__ == "__main__":
    # Small deterministic example: batch=16, nodes=8, p=32 (grid has 2 steps).
    B, N, P = 16, 8, 32
    key = jax.random.PRNGKey(0)
    k_mu, k_adj, k_w1, k_b1, k_w2, k_b2 = jax.random.split(key, 6)

    mu_v = jax.random.normal(k_mu, (B, N, P), dtype=jnp.float32)
    adjacency = (jax.random.uniform(k_adj, (B, N, N)) > 0.5).astype(jnp.float32)

    # Parameters stored as (in, out) = transpose of torch's nn.Linear.weight.
    w1 = jax.random.normal(k_w1, (2 * P, 2 * P), dtype=jnp.float32) * 0.1
    b1 = jax.random.normal(k_b1, (2 * P,), dtype=jnp.float32) * 0.1
    w2 = jax.random.normal(k_w2, (2 * P, P), dtype=jnp.float32) * 0.1
    b2 = jax.random.normal(k_b2, (P,), dtype=jnp.float32) * 0.1

    out = processor_network(mu_v, adjacency, w1, b1, w2, b2)
    out = jax.block_until_ready(out)

    ref = processor_network_ref(mu_v, adjacency, w1, b1, w2, b2)
    assert out.shape == (B, N, P)
    # bf16 MXU inputs with f32 accumulation -> loosened tolerance (per review).
    max_err = float(jnp.max(jnp.abs(out - ref)))
    assert jnp.allclose(out, ref, atol=5e-2, rtol=5e-2), (
        f"mismatch vs reference, max abs err = {max_err}")

    print("KERNEL_OK")
</pallas_src>

<mosaic_0001>
module attributes {stable_mosaic.version = 11 : i64} {
  func.func @_processor_kernel(%arg0: i32, %arg1: memref<8x8x32xf32, #tpu.memory_space<vmem>>, %arg2: memref<8x8x8xf32, #tpu.memory_space<vmem>>, %arg3: memref<64x64xbf16, #tpu.memory_space<vmem>>, %arg4: memref<1x64xf32, #tpu.memory_space<vmem>>, %arg5: memref<64x32xbf16, #tpu.memory_space<vmem>>, %arg6: memref<1x32xf32, #tpu.memory_space<vmem>>, %arg7: memref<8x8x32xf32, #tpu.memory_space<vmem>>) attributes {dimension_semantics = [#tpu.dimension_semantics<parallel>], iteration_bounds = array<i64: 2>, scalar_prefetch = 0 : i64, scratch_operands = 0 : i64, tpu.core_type = #tpu.core_type<tc>, window_params = [{transform_indices = @transform_0, window_bounds = array<i64: 8, 8, 32>}, {transform_indices = @transform_1, window_bounds = array<i64: 8, 8, 8>}, {pipeline_mode = #tpu.pipeline_mode<synchronous>, transform_indices = @transform_2, window_bounds = array<i64: 64, 64>}, {pipeline_mode = #tpu.pipeline_mode<synchronous>, transform_indices = @transform_3, window_bounds = array<i64: 1, 64>}, {pipeline_mode = #tpu.pipeline_mode<synchronous>, transform_indices = @transform_4, window_bounds = array<i64: 64, 32>}, {pipeline_mode = #tpu.pipeline_mode<synchronous>, transform_indices = @transform_5, window_bounds = array<i64: 1, 32>}, {transform_indices = @transform_6, window_bounds = array<i64: 8, 8, 32>}]} {
    %c0 = arith.constant 0 : index
    %c0_0 = arith.constant 0 : index
    %c0_1 = arith.constant 0 : index
    %0 = vector.load %arg1[%c0, %c0_0, %c0_1] : memref<8x8x32xf32, #tpu.memory_space<vmem>>, vector<8x8x32xf32>
    %c0_2 = arith.constant 0 : index
    %c0_3 = arith.constant 0 : index
    %c0_4 = arith.constant 0 : index
    %1 = vector.load %arg2[%c0_2, %c0_3, %c0_4] : memref<8x8x8xf32, #tpu.memory_space<vmem>>, vector<8x8x8xf32>
    %cst = arith.constant 0.000000e+00 : f32
    %2 = vector.broadcast %cst : f32 to vector<8x8x32xf32>
    %3 = vector.extract_strided_slice %1 {offsets = [0, 0, 0], sizes = [8, 8, 1], strides = [1, 1, 1]} : vector<8x8x8xf32> to vector<8x8x1xf32>
    %4 = vector.extract_strided_slice %0 {offsets = [0, 0, 0], sizes = [8, 1, 32], strides = [1, 1, 1]} : vector<8x8x32xf32> to vector<8x1x32xf32>
    %5 = vector.broadcast %4 : vector<8x1x32xf32> to vector<8x8x32xf32>
    %6 = arith.subf %5, %0 : vector<8x8x32xf32>
    %7 = vector.broadcast %3 : vector<8x8x1xf32> to vector<8x8x32xf32>
    %8 = arith.mulf %7, %6 : vector<8x8x32xf32>
    %9 = arith.addf %2, %8 : vector<8x8x32xf32>
    %10 = vector.extract_strided_slice %1 {offsets = [0, 0, 1], sizes = [8, 8, 1], strides = [1, 1, 1]} : vector<8x8x8xf32> to vector<8x8x1xf32>
    %11 = vector.extract_strided_slice %0 {offsets = [0, 1, 0], sizes = [8, 1, 32], strides = [1, 1, 1]} : vector<8x8x32xf32> to vector<8x1x32xf32>
    %12 = vector.broadcast %11 : vector<8x1x32xf32> to vector<8x8x32xf32>
    %13 = arith.subf %12, %0 : vector<8x8x32xf32>
    %14 = vector.broadcast %10 : vector<8x8x1xf32> to vector<8x8x32xf32>
    %15 = arith.mulf %14, %13 : vector<8x8x32xf32>
    %16 = arith.addf %9, %15 : vector<8x8x32xf32>
    %17 = vector.extract_strided_slice %1 {offsets = [0, 0, 2], sizes = [8, 8, 1], strides = [1, 1, 1]} : vector<8x8x8xf32> to vector<8x8x1xf32>
    %18 = vector.extract_strided_slice %0 {offsets = [0, 2, 0], sizes = [8, 1, 32], strides = [1, 1, 1]} : vector<8x8x32xf32> to vector<8x1x32xf32>
    %19 = vector.broadcast %18 : vector<8x1x32xf32> to vector<8x8x32xf32>
    %20 = arith.subf %19, %0 : vector<8x8x32xf32>
    %21 = vector.broadcast %17 : vector<8x8x1xf32> to vector<8x8x32xf32>
    %22 = arith.mulf %21, %20 : vector<8x8x32xf32>
    %23 = arith.addf %16, %22 : vector<8x8x32xf32>
    %24 = vector.extract_strided_slice %1 {offsets = [0, 0, 3], sizes = [8, 8, 1], strides = [1, 1, 1]} : vector<8x8x8xf32> to vector<8x8x1xf32>
    %25 = vector.extract_strided_slice %0 {offsets = [0, 3, 0], sizes = [8, 1, 32], strides = [1, 1, 1]} : vector<8x8x32xf32> to vector<8x1x32xf32>
    %26 = vector.broadcast %25 : vector<8x1x32xf32> to vector<8x8x32xf32>
    %27 = arith.subf %26, %0 : vector<8x8x32xf32>
    %28 = vector.broadcast %24 : vector<8x8x1xf32> to vector<8x8x32xf32>
    %29 = arith.mulf %28, %27 : vector<8x8x32xf32>
    %30 = arith.addf %23, %29 : vector<8x8x32xf32>
    %31 = vector.extract_strided_slice %1 {offsets = [0, 0, 4], sizes = [8, 8, 1], strides = [1, 1, 1]} : vector<8x8x8xf32> to vector<8x8x1xf32>
    %32 = vector.extract_strided_slice %0 {offsets = [0, 4, 0], sizes = [8, 1, 32], strides = [1, 1, 1]} : vector<8x8x32xf32> to vector<8x1x32xf32>
    %33 = vector.broadcast %32 : vector<8x1x32xf32> to vector<8x8x32xf32>
    %34 = arith.subf %33, %0 : vector<8x8x32xf32>
    %35 = vector.broadcast %31 : vector<8x8x1xf32> to vector<8x8x32xf32>
    %36 = arith.mulf %35, %34 : vector<8x8x32xf32>
    %37 = arith.addf %30, %36 : vector<8x8x32xf32>
    %38 = vector.extract_strided_slice %1 {offsets = [0, 0, 5], sizes = [8, 8, 1], strides = [1, 1, 1]} : vector<8x8x8xf32> to vector<8x8x1xf32>
    %39 = vector.extract_strided_slice %0 {offsets = [0, 5, 0], sizes = [8, 1, 32], strides = [1, 1, 1]} : vector<8x8x32xf32> to vector<8x1x32xf32>
    %40 = vector.broadcast %39 : vector<8x1x32xf32> to vector<8x8x32xf32>
    %41 = arith.subf %40, %0 : vector<8x8x32xf32>
    %42 = vector.broadcast %38 : vector<8x8x1xf32> to vector<8x8x32xf32>
    %43 = arith.mulf %42, %41 : vector<8x8x32xf32>
    %44 = arith.addf %37, %43 : vector<8x8x32xf32>
    %45 = vector.extract_strided_slice %1 {offsets = [0, 0, 6], sizes = [8, 8, 1], strides = [1, 1, 1]} : vector<8x8x8xf32> to vector<8x8x1xf32>
    %46 = vector.extract_strided_slice %0 {offsets = [0, 6, 0], sizes = [8, 1, 32], strides = [1, 1, 1]} : vector<8x8x32xf32> to vector<8x1x32xf32>
    %47 = vector.broadcast %46 : vector<8x1x32xf32> to vector<8x8x32xf32>
    %48 = arith.subf %47, %0 : vector<8x8x32xf32>
    %49 = vector.broadcast %45 : vector<8x8x1xf32> to vector<8x8x32xf32>
    %50 = arith.mulf %49, %48 : vector<8x8x32xf32>
    %51 = arith.addf %44, %50 : vector<8x8x32xf32>
    %52 = vector.extract_strided_slice %1 {offsets = [0, 0, 7], sizes = [8, 8, 1], strides = [1, 1, 1]} : vector<8x8x8xf32> to vector<8x8x1xf32>
    %53 = vector.extract_strided_slice %0 {offsets = [0, 7, 0], sizes = [8, 1, 32], strides = [1, 1, 1]} : vector<8x8x32xf32> to vector<8x1x32xf32>
    %54 = vector.broadcast %53 : vector<8x1x32xf32> to vector<8x8x32xf32>
    %55 = arith.subf %54, %0 : vector<8x8x32xf32>
    %56 = vector.broadcast %52 : vector<8x8x1xf32> to vector<8x8x32xf32>
    %57 = arith.mulf %56, %55 : vector<8x8x32xf32>
    %58 = arith.addf %51, %57 : vector<8x8x32xf32>
    %59 = vector.shape_cast %0 : vector<8x8x32xf32> to vector<64x32xf32>
    %60 = vector.shape_cast %58 : vector<8x8x32xf32> to vector<64x32xf32>
    %61 = tpu.concatenate %59, %60 in 1 : vector<64x32xf32>, vector<64x32xf32> -> vector<64x64xf32>
    %62 = arith.truncf %61 : vector<64x64xf32> to vector<64x64xbf16>
    %c0_5 = arith.constant 0 : index
    %c0_6 = arith.constant 0 : index
    %63 = vector.load %arg3[%c0_5, %c0_6] : memref<64x64xbf16, #tpu.memory_space<vmem>>, vector<64x64xbf16>
    %cst_7 = arith.constant dense<0.000000e+00> : vector<64x64xf32>
    %64 = tpu.matmul %62, %63, %cst_7 {dimension_numbers = #tpu.dot_dimension_numbers<[1], [0], [0], [1], [0, 0, 1, 1], [], []>} : vector<64x64xbf16>, vector<64x64xbf16>, vector<64x64xf32> -> vector<64x64xf32>
    %c0_8 = arith.constant 0 : index
    %c0_9 = arith.constant 0 : index
    %65 = vector.load %arg4[%c0_8, %c0_9] : memref<1x64xf32, #tpu.memory_space<vmem>>, vector<1x64xf32>
    %66 = vector.broadcast %65 : vector<1x64xf32> to vector<64x64xf32>
    %67 = arith.addf %64, %66 : vector<64x64xf32>
    %cst_10 = arith.constant 0.000000e+00 : f32
    %68 = vector.broadcast %cst_10 : f32 to vector<64x64xf32>
    %69 = arith.maximumf %67, %68 : vector<64x64xf32>
    %70 = arith.truncf %69 : vector<64x64xf32> to vector<64x64xbf16>
    %c0_11 = arith.constant 0 : index
    %c0_12 = arith.constant 0 : index
    %71 = vector.load %arg5[%c0_11, %c0_12] : memref<64x32xbf16, #tpu.memory_space<vmem>>, vector<64x32xbf16>
    %cst_13 = arith.constant dense<0.000000e+00> : vector<64x32xf32>
    %72 = tpu.matmul %70, %71, %cst_13 {dimension_numbers = #tpu.dot_dimension_numbers<[1], [0], [0], [1], [0, 0, 1, 1], [], []>} : vector<64x64xbf16>, vector<64x32xbf16>, vector<64x32xf32> -> vector<64x32xf32>
    %c0_14 = arith.constant 0 : index
    %c0_15 = arith.constant 0 : index
    %73 = vector.load %arg6[%c0_14, %c0_15] : memref<1x32xf32, #tpu.memory_space<vmem>>, vector<1x32xf32>
    %74 = vector.broadcast %73 : vector<1x32xf32> to vector<64x32xf32>
    %75 = arith.addf %72, %74 : vector<64x32xf32>
    %cst_16 = arith.constant 0.000000e+00 : f32
    %76 = vector.broadcast %cst_16 : f32 to vector<64x32xf32>
    %77 = arith.maximumf %75, %76 : vector<64x32xf32>
    %78 = vector.shape_cast %77 : vector<64x32xf32> to vector<8x8x32xf32>
    %c0_17 = arith.constant 0 : index
    %c0_18 = arith.constant 0 : index
    %c0_19 = arith.constant 0 : index
    %79 = vector.load %arg7[%c0_17, %c0_18, %c0_19] : memref<8x8x32xf32, #tpu.memory_space<vmem>>, vector<8x8x32xf32>
    tpu.vector_store %arg7[%c0_17, %c0_18, %c0_19], %78 {strides = array<i32>} : memref<8x8x32xf32, #tpu.memory_space<vmem>>, vector<8x8x32xf32>,
    return
  }
  func.func @transform_0(%arg0: i32) -> (i32, i32, i32) {
    %c0_i32 = arith.constant 0 : i32
    %c0_i32_0 = arith.constant 0 : i32
    %c0_i32_1 = arith.constant 0 : i32
    return %arg0, %c0_i32, %c0_i32_0 : i32, i32, i32
  }
  func.func @transform_1(%arg0: i32) -> (i32, i32, i32) {
    %c0_i32 = arith.constant 0 : i32
    %c0_i32_0 = arith.constant 0 : i32
    %c0_i32_1 = arith.constant 0 : i32
    return %arg0, %c0_i32, %c0_i32_0 : i32, i32, i32
  }
  func.func @transform_2(%arg0: i32) -> (i32, i32) {
    %c0_i32 = arith.constant 0 : i32
    %c0_i32_0 = arith.constant 0 : i32
    %c0_i32_1 = arith.constant 0 : i32
    return %c0_i32, %c0_i32_0 : i32, i32
  }
  func.func @transform_3(%arg0: i32) -> (i32, i32) {
    %c0_i32 = arith.constant 0 : i32
    %c0_i32_0 = arith.constant 0 : i32
    %c0_i32_1 = arith.constant 0 : i32
    return %c0_i32, %c0_i32_0 : i32, i32
  }
  func.func @transform_4(%arg0: i32) -> (i32, i32) {
    %c0_i32 = arith.constant 0 : i32
    %c0_i32_0 = arith.constant 0 : i32
    %c0_i32_1 = arith.constant 0 : i32
    return %c0_i32, %c0_i32_0 : i32, i32
  }
  func.func @transform_5(%arg0: i32) -> (i32, i32) {
    %c0_i32 = arith.constant 0 : i32
    %c0_i32_0 = arith.constant 0 : i32
    %c0_i32_1 = arith.constant 0 : i32
    return %c0_i32, %c0_i32_0 : i32, i32
  }
  func.func @transform_6(%arg0: i32) -> (i32, i32, i32) {
    %c0_i32 = arith.constant 0 : i32
    %c0_i32_0 = arith.constant 0 : i32
    %c0_i32_1 = arith.constant 0 : i32
    return %arg0, %c0_i32, %c0_i32_0 : i32, i32, i32
  }
}

</mosaic_0001>

<bundles_post_ra>
// kernel: tpu_custom_call.1
= control target key start
LH: loop header
LB: loop body
LE: loop exit
PB: predicated region body
PF: predicated region fallthrough
CT: control target
= control target key end

     0   :  { %11 = vsyncpa [#allocation3], 0  ;;  %s2318_s0 = inlined_call_operand.vmem [shape: f32[16,8,32], index: 0, kind: input, shape index: {}]   ;;  %s2319_s1 = inlined_call_operand.vmem [shape: f32[16,8,8], index: 1, kind: input, shape index: {}]   ;;  %s2320_s2 = inlined_call_operand.vmem [shape: bf16[64,64], index: 2, kind: input, shape index: {}]   ;;  %s2321_s3 = inlined_call_operand.vmem [shape: f32[1,64], index: 3, kind: input, shape index: {}]   ;;  %s2322_s4 = inlined_call_operand.vmem [shape: bf16[64,32], index: 4, kind: input, shape index: {}]   ;;  %s2323_s5 = inlined_call_operand.vmem [shape: f32[1,32], index: 5, kind: input, shape index: {}]   ;;  %s2324_s6 = inlined_call_operand.hbm [shape: f32[16,8,32], index: 6, kind: output, shape index: {}]  }
   0x1   :  { %13 = vsyncpa [#allocation3 + $0x1], 0  ;;  %s1701_s21 = smov 0   ;;  %s1703_s22 = smov 0  }
   0x2   :  { %s1705_s23 = smov 0   ;;  %s1707_s24 = smov 0  }
   0x3 LB: > { %s1722_s25 = sadd.s32 4294967295, %s1652_s24   ;;  %s1398_s26 = sadd.s32 4294967294, %s1652_s24   ;;  %s1652_s24 = sphi %s1707_s24, %s2330_s24   ;;  %s1648_s23 = sphi %s1705_s23, %s2329_s23   ;;  %s1644_s22 = sphi %s1703_s22, %s2328_s22   ;;  %s1640_s21 = sphi %s1701_s21, %s2327_s21  }
   0x4   : > { %s1726_s27 = sadd.s32 1, %s1652_s24   ;;  %s162_s28 = sadd.s32 1, %s1648_s23 }
   0x5   : > { %s159_s29 = ssub.s32 %s1652_s24, %s1726_s27  ;;  %p172_p0 = scmp.ne.s32.totalorder %s1648_s23, %s1644_s22 }
   0x6   : > { %p160_p1 = scmp.eq.s32.totalorder %s159_s29, 0  ;;  %p173_p2 = scmp.eq.s32.totalorder %s1722_s25, 1 }
   0x7   : > { %p178_p3 = scmp.ne.s32.totalorder %s1644_s22, %s1640_s21  ;;  %p179_p4 = scmp.eq.s32.totalorder %s1398_s26, 1 }
   0x8   : > { %s1737_s30 = scalar_select %p160_p1, %s1648_s23, %s162_s28  }
   0x9   : > { %p1739_p5 = por %p173_p2, %p172_p0  ;;  %p1743_p6 = por %p179_p4, %p178_p3 }
   0xa   : > { %p1401_p7 = scmp.ge.s32.totalorder %s1652_s24, 1  ;;  %p227_p8 = scmp.lt.s32.totalorder %s1652_s24, 3 }
   0xc   : > { %p228_p9 = pnand %p1401_p7, %p227_p8 }
   0xd   : > { %s1403_s9 = sshll.u32 (!%p228_p9), %s1722_s25, 3  ;;  %v1654_v0 = vmov (!%p228_p9), 1   ;;  %v1655_v1 = vmov (!%p228_p9), 0   ;;  %v1656_v8 = vmov (!%p228_p9), 2   ;;  %v1657_v11 = vmov (!%p228_p9), 3   ;;  %s1662_s29 = smov (!%p228_p9), 32  }
   0xe   : > { %231 = sbr.rel (%p228_p9) target bundleno = 914 (0x392), region = 44  ;;  %1530 = vset.pattern.permute.xlu1 (!%p228_p9), %v1654_v0  ;;  %1529 = vset.pattern.permute.xlu0 (!%p228_p9), %v1655_v1  ;;  %p263_p10 = scmp.lt.s32.totalorder (!%p228_p9), %s1403_s9, 15  ;;  %v1658_v12 = vmov (!%p228_p9), 4   ;;  %v1659_v13 = vmov (!%p228_p9), 7   ;;  %v1660_v14 = vmov (!%p228_p9), 5   ;;  %v1661_v15 = vmov (!%p228_p9), 6  }
   0xf   : > { %v292_v16 = vlaneseq (!%p228_p9)  ;;  %vm1036_vm0 = vcmask (!%p228_p9), 261120   ;;  %vm1088_vm1 = vcmask (!%p228_p9), 523264   ;;  %s259_s26 = sand.u32 (!%p228_p9), 1, %s1644_s22   ;;  %s1430_s11 = sshll.u32 (!%p228_p9), %s1722_s25, 10 }
  0x10   : > { %s2268_s15 = scalar_lea.hbm (!%p228_p9), %s2324_s6, %s1430_s11  ;;  %s2277_s25 = scalar_lea.sflag (!%p228_p9), [#allocation3], %s259_s26 }
  0x11   : > { %v1848_v17 = vshrl.u32 (!%p228_p9), %v292_v16, 7  ;;  %s1663_s17 = smov (!%p228_p9), [#allocation2]  }
  0x12   : > { %s1594_s18 = sshll.u32 (!%p228_p9), %s1663_s17, 4  ;;  %s1595_s18 = int_to_ptr.vmem [resolvable:$false] %s1594_s18 }
  0x13   : > { %v1860_v18 = vsub.s32 (!%p228_p9), 1, %v1848_v17  ;;  %v1863_v19 = vsub.s32 (!%p228_p9), 0, %v1848_v17  ;;  %v1889_v36 = vsub.s32 (!%p228_p9), 2, %v1848_v17  ;;  %s1596_s19 = scalar_lea.vmem (!%p228_p9), %s1595_s18, 2048 }
  0x15   : > { %s2332_s9 = smov (!%p263_p10, %s1403_s9), 15 }
  0x16   : > { %s1404_s10 = sshll.u32 %s2332_s9, 3  ;;  %s1402_s9 = sshll.u32 %s259_s26, 6 }
  0x17   : > { %s272_s13 = scalar_lea.vmem %s2319_s1, %s1404_s10  ;;  %s1855_s16 = scalar_lea.vmem %s2318_s0, %s1404_s10 }
  0x18   : > { %v1760_v2 = vld [vmem:[%s272_s13] sm:$0xff]  ;;  %v1764_v3 = vld [vmem:[%s272_s13 + $0x8] sm:$0xff]  ;;  %v1768_v4 = vld [vmem:[%s272_s13 + $0x10] sm:$0xff]  ;;  %s261_s10 = scalar_lea.vmem [#allocation2], %s1402_s9 }
  0x19   : > { %429 = vperm.xlu1 %1530, %v1760_v2   ;;  %334 = vperm.xlu0 %1529, %v1760_v2   ;;  %v1770_v5 = vld [vmem:[%s272_s13 + $0x18] sm:$0xff]  ;;  %v1775_v6 = vld [vmem:[%s272_s13 + $0x20] sm:$0xff]  ;;  %v1779_v7 = vld [vmem:[%s272_s13 + $0x30] sm:$0xff]  ;;  %s1324_s12 = sshll.u32 %s261_s10, 4  ;;  %s2270_s12 = int_to_ptr.vmem [resolvable:$true] %s1324_s12 }
  0x1a   : > { %v1787_v9 = vld [vmem:[%s272_s13 + $0x28] sm:$0xff]  ;;  %v1791_v10 = vld [vmem:[%s272_s13 + $0x38] sm:$0xff]  ;;  %v1866_v20 = vld [vmem:[%s1855_s16] sm:$0xff]  ;;  %p1597_p0 = scmp.lt.s32.totalorder %s2270_s12, %s1595_s18 }
  0x1b   : > { %v391_v21 = vrot.slane %v1866_v20, %v1860_v18  ;;  %v295_v22 = vrot.slane %v1866_v20, %v1863_v19  ;;  %v1880_v32 = vld [vmem:[%s1855_s16 + $0x18] sm:$0xff]  ;;  %v1892_v38 = vld [vmem:[%s1855_s16 + $0x10] sm:$0xff]  ;;  %v479_v43 = vrot.slane %v1866_v20, %v1889_v36  ;;  %v1915_v55 = vld [vmem:[%s1855_s16 + $0x8] sm:$0xff] }
  0x1c   : > { %v307_v33 = vrot.slane %v1880_v32, %v1863_v19  ;;  %v403_v34 = vrot.slane %v1880_v32, %v1860_v18  ;;  %v303_v41 = vrot.slane %v1892_v38, %v1863_v19  ;;  %v399_v45 = vrot.slane %v1892_v38, %v1860_v18 }
  0x1d   : > { %433 = vperm.xlu1 %1530, %v1764_v3   ;;  %339 = vperm.xlu0 %1529, %v1764_v3   ;;  %v420_v23 = vsub.f32 %v391_v21, %v1866_v20  ;;  %v324_v24 = vsub.f32 %v295_v22, %v1866_v20  ;;  %v508_v50 = vsub.f32 %v479_v43, %v1866_v20  ;;  %v1952_v43 = vsub.s32 4, %v1848_v17 }
  0x1e   : > { %v327_v39 = vsub.f32 %v307_v33, %v1880_v32  ;;  %v423_v40 = vsub.f32 %v403_v34, %v1880_v32  ;;  %v326_v48 = vsub.f32 %v303_v41, %v1892_v38  ;;  %v487_v51 = vrot.slane %v1892_v38, %v1889_v36 }
  0x1f   : > { %v422_v53 = vsub.f32 %v399_v45, %v1892_v38  ;;  %v491_v59 = vrot.slane %v1880_v32, %v1889_v36  ;;  %v395_v63 = vrot.slane %v1915_v55, %v1860_v18  ;;  %v483_v21 = vrot.slane %v1915_v55, %v1889_v36 }
  0x20   : > { %v510_v58 = vsub.f32 %v487_v51, %v1892_v38 }
  0x21   : > { %1531 = vset.pattern.permute.xlu1 %v1655_v1  ;;  %344 = vperm.xlu0 %1529, %v1768_v4  }
  0x22   : > { %349 = vperm.xlu1 %1531, %v1770_v5  }
  0x25   : > { %354 = vperm.xlu0 %1529, %v1775_v6  }
  0x26   : > { %1532 = vset.pattern.permute.xlu1 %v1654_v0 }
  0x27   : > { %441 = vperm.xlu1 %1532, %v1770_v5  }
  0x29   : > { %364 = vperm.xlu0 %1529, %v1779_v7  }
  0x2b   : > { %1533 = vset.pattern.permute.xlu1 %v1656_v8 }
  0x2c   : > { %517 = vperm.xlu1 %1533, %v1760_v2  }
  0x2d   : > { %1539 = vset.pattern.permute.xlu0 %v1654_v0 }
  0x2e   : > { %437 = vperm.xlu0 %1539, %v1768_v4  }
  0x30   : > { %525 = vperm.xlu1 %1533, %v1768_v4  }
  0x32   : > { %449 = vperm.xlu0 %1539, %v1787_v9  }
  0x34   : > { %529 = vperm.xlu1 %1533, %v1770_v5  }
  0x36   : > { %457 = vperm.xlu0 %1539, %v1791_v10  }
  0x38   : > { %1534 = vset.pattern.permute.xlu1 %v1657_v11 }
  0x39   : > { %609 = vperm.xlu1 %1534, %v1764_v3  }
  0x3a   : > { %1542 = vset.pattern.permute.xlu0 %v1656_v8 }
  0x3b   : > { %521 = vperm.xlu0 %1542, %v1764_v3  }
  0x3d   : > { %613 = vperm.xlu1 %1534, %v1768_v4  }
  0x3f   : > { %533 = vperm.xlu0 %1542, %v1775_v6  }
  0x41   : > { %1535 = vset.pattern.permute.xlu1 %v1658_v12 }
  0x42   : > { %693 = vperm.xlu1 %1535, %v1760_v2  }
  0x43   : > { %1544 = vset.pattern.permute.xlu0 %v1657_v11 }
  0x44   : > { %605 = vperm.xlu0 %1544, %v1760_v2  }
  0x46   : > { %701 = vperm.xlu1 %1535, %v1768_v4  }
  0x48   : > { %617 = vperm.xlu0 %1544, %v1770_v5  }
  0x4a   : > { %705 = vperm.xlu1 %1535, %v1770_v5  }
  0x4c   : > { %621 = vperm.xlu0 %1544, %v1775_v6  }
  0x4e   : > { %1536 = vset.pattern.permute.xlu1 %v1655_v1 }
  0x4f   : > { %359 = vperm.xlu1 %1536, %v1787_v9  }
  0x50   : > { %1551 = vset.pattern.permute.xlu0 %v1659_v13 }
  0x51   : > { %961 = vperm.xlu0 %1551, %v1764_v3  }
  0x53   : > { %1537 = vset.pattern.permute.xlu1 %v1654_v0 }
  0x54   : > { %445 = vperm.xlu1 %1537, %v1775_v6  }
  0x55   : > { %965 = vperm.xlu0 %1551, %v1768_v4  }
  0x58   : > { %1538 = vset.pattern.permute.xlu1 %v1660_v14 }
  0x59   : > { %781 = vperm.xlu1 %1538, %v1760_v2   ;;  %1553 = vset.pattern.permute.xlu0 %v1658_v12 }
  0x5a   : > { %697 = vperm.xlu0 %1553, %v1764_v3  }
  0x5d   : > { %785 = vperm.xlu1 %1538, %v1764_v3  }
  0x5e   : > { %709 = vperm.xlu0 %1553, %v1775_v6  }
  0x61   : > { %1540 = vset.pattern.permute.xlu1 %v1655_v1 }
  0x62   : > { %369 = vperm.xlu1 %1540, %v1791_v10   ;;  %721 = vperm.xlu0 %1553, %v1791_v10  }
  0x66   : > { %1541 = vset.pattern.permute.xlu1 %v1654_v0  ;;  %1557 = vset.pattern.permute.xlu0 %v1660_v14  ;;  %v299_v0 = vrot.slane %v1915_v55, %v1863_v19 }
  0x67   : > { %453 = vperm.xlu1 %1541, %v1779_v7   ;;  %801 = vperm.xlu0 %1557, %v1787_v9  }
  0x6b   : > { %1543 = vset.pattern.permute.xlu1 %v1660_v14  ;;  %1558 = vset.pattern.permute.xlu0 %v1661_v15 }
  0x6c   : > { %789 = vperm.xlu1 %1543, %v1768_v4   ;;  %873 = vperm.xlu0 %1558, %v1764_v3  }
  0x70   : > { %793 = vperm.xlu1 %1543, %v1770_v5   ;;  %877 = vperm.xlu0 %1558, %v1768_v4   ;;  %v511_v4 = vsub.f32 %v491_v59, %v1880_v32 }
  0x74   : > { %1545 = vset.pattern.permute.xlu1 %v1656_v8  ;;  %885 = vperm.xlu0 %1558, %v1775_v6  }
  0x75   : > { %537 = vperm.xlu1 %1545, %v1787_v9  }
  0x78   : > { %897 = vperm.xlu0 %1558, %v1791_v10  }
  0x79   : > { %1546 = vset.pattern.permute.xlu1 %v1661_v15 }
  0x7a   : > { %869 = vperm.xlu1 %1546, %v1760_v2  }
  0x7c   : > { %1561 = vset.pattern.permute.xlu0 %v1659_v13 }
  0x7d   : > { %977 = vperm.xlu0 %1561, %v1787_v9  }
  0x7e   : > { %1547 = vset.pattern.permute.xlu1 %v1656_v8  ;;  %v1932_v8 = vsub.s32 3, %v1848_v17 }
  0x7f   : > { %541 = vperm.xlu1 %1547, %v1779_v7  }
  0x83   : > { %545 = vperm.xlu1 %1547, %v1791_v10  }
  0x87   : > { %1548 = vset.pattern.permute.xlu1 %v1661_v15 }
  0x88   : > { %881 = vperm.xlu1 %1548, %v1770_v5  }
  0x8c   : > { %1549 = vset.pattern.permute.xlu1 %v1657_v11 }
  0x8d   : > { %625 = vperm.xlu1 %1549, %v1787_v9  }
  0x91   : > { %1550 = vset.pattern.permute.xlu1 %v1659_v13 }
  0x92   : > { %957 = vperm.xlu1 %1550, %v1760_v2  }
  0x96   : > { %1552 = vset.pattern.permute.xlu1 %v1657_v11 }
  0x97   : > { %629 = vperm.xlu1 %1552, %v1779_v7  }
  0x98   : > { %v430_v25 = vpop.permute.xlu1 %429  ;;  %v335_v26 = vpop.permute.xlu0 %334 }
  0x99   : > { %v460_v27 = vmul.f32 %v430_v25, %v420_v23  ;;  %v372_v28 = vmul.f32 %v335_v26, %v324_v24  ;;  %v571_v24 = vrot.slane %v1915_v55, %v1932_v8  ;;  %v575_v25 = vrot.slane %v1892_v38, %v1932_v8 }
  0x9b   : > { %v468_v29 = vadd.f32 %v460_v27, %v372_v28  ;;  %633 = vperm.xlu1 %1552, %v1791_v10   ;;  %v597_v34 = vsub.f32 %v571_v24, %v1915_v55 }
  0x9c   : > { %v434_v30 = vpop.permute.xlu1 %433  ;;  %v340_v31 = vpop.permute.xlu0 %339 }
  0x9f   : > { %1554 = vset.pattern.permute.xlu1 %v1659_v13 }
  0xa0   : > { %969 = vperm.xlu1 %1554, %v1770_v5   ;;  %v345_v35 = vpop.permute.xlu0 %344 }
  0xa1   : > { %v350_v37 = vpop.permute.xlu1 %349  ;;  %v374_v56 = vmul.f32 %v345_v35, %v326_v48  ;;  %v598_v35 = vsub.f32 %v575_v25, %v1892_v38 }
  0xa2   : > { %v375_v46 = vmul.f32 %v350_v37, %v327_v39 }
  0xa4   : > { %1555 = vset.pattern.permute.xlu1 %v1658_v12  ;;  %v1899_v42 = vpop.permute.xlu0 %354  ;;  %v421_v12 = vsub.f32 %v395_v63, %v1915_v55 }
  0xa5   : > { %713 = vperm.xlu1 %1555, %v1787_v9  }
  0xa6   : > { %v442_v44 = vpop.permute.xlu1 %441  ;;  %v461_v27 = vmul.f32 %v434_v30, %v421_v12 }
  0xa7   : > { %v463_v47 = vmul.f32 %v442_v44, %v423_v40 }
  0xa8   : > { %v1907_v49 = vpop.permute.xlu0 %364 }
  0xa9   : > { %v471_v52 = vadd.f32 %v463_v47, %v375_v46  ;;  %717 = vperm.xlu1 %1555, %v1779_v7   ;;  %v663_v46 = vrot.slane %v1892_v38, %v1952_v43 }
  0xab   : > { %v518_v54 = vpop.permute.xlu1 %517  ;;  %v686_v51 = vsub.f32 %v663_v46, %v1892_v38 }
  0xac   : > { %v548_v57 = vmul.f32 %v518_v54, %v508_v50  ;;  %v1964_v50 = vld [vmem:[%s1855_s16 + $0x28] sm:$0xff] }
  0xad   : > { %1556 = vset.pattern.permute.xlu1 %v1660_v14  ;;  %v438_v60 = vpop.permute.xlu0 %437  ;;  %v325_v14 = vsub.f32 %v299_v0, %v1915_v55  ;;  %v315_v63 = vrot.slane %v1964_v50, %v1863_v19 }
  0xae   : > { %v1921_v61 = vadd.f32 %v548_v57, %v468_v29  ;;  %v462_v62 = vmul.f32 %v438_v60, %v422_v53  ;;  %797 = vperm.xlu1 %1556, %v1775_v6   ;;  %v509_v29 = vsub.f32 %v483_v21, %v1915_v55  ;;  %v1978_v60 = vld [vmem:[%s1855_s16 + $0x20] sm:$0xff] }
  0xaf   : > { %v526_v1 = vpop.permute.xlu1 %525  ;;  %v373_v28 = vmul.f32 %v340_v31, %v325_v14  ;;  %v495_v12 = vrot.slane %v1978_v60, %v1889_v36 }
  0xb0   : > { %v470_v2 = vadd.f32 %v462_v62, %v374_v56  ;;  %v550_v3 = vmul.f32 %v526_v1, %v510_v58  ;;  %v411_v56 = vrot.slane %v1964_v50, %v1860_v18 }
  0xb1   : > { %v1929_v5 = vpop.permute.xlu0 %449  ;;  %v469_v39 = vadd.f32 %v461_v27, %v373_v28 }
  0xb2   : > { %v558_v11 = vadd.f32 %v550_v3, %v470_v2  ;;  %805 = vperm.xlu1 %1556, %v1779_v7   ;;  %v311_v2 = vrot.slane %v1978_v60, %v1863_v19 }
  0xb3   : > { %v530_v16 = vpop.permute.xlu1 %529 }
  0xb4   : > { %v551_v22 = vmul.f32 %v530_v16, %v511_v4  ;;  %v328_v21 = vsub.f32 %v311_v2, %v1978_v60 }
  0xb5   : > { %v1939_v23 = vpop.permute.xlu0 %457 }
  0xb6   : > { %v559_v26 = vadd.f32 %v551_v22, %v471_v52  ;;  %809 = vperm.xlu1 %1556, %v1791_v10   ;;  %v667_v52 = vrot.slane %v1880_v32, %v1952_v43  ;;  %v583_v22 = vrot.slane %v1978_v60, %v1932_v8 }
  0xb8   : > { %v610_v33 = vpop.permute.xlu1 %609  ;;  %v687_v59 = vsub.f32 %v667_v52, %v1880_v32 }
  0xb9   : > { %v637_v30 = vmul.f32 %v610_v33, %v597_v34 }
  0xba   : > { %1559 = vset.pattern.permute.xlu1 %v1661_v15  ;;  %v522_v37 = vpop.permute.xlu0 %521 }
  0xbb   : > { %v549_v40 = vmul.f32 %v522_v37, %v509_v29  ;;  %889 = vperm.xlu1 %1559, %v1787_v9   ;;  %v579_v9 = vrot.slane %v1880_v32, %v1932_v8  ;;  %v600_v29 = vsub.f32 %v583_v22, %v1978_v60 }
  0xbc   : > { %v614_v41 = vpop.permute.xlu1 %613 }
  0xbd   : > { %v557_v31 = vadd.f32 %v549_v40, %v469_v39  ;;  %v638_v44 = vmul.f32 %v614_v41, %v598_v35  ;;  %v599_v54 = vsub.f32 %v579_v9, %v1880_v32  ;;  %v2005_v35 = vld [vmem:[%s1855_s16 + $0x38] sm:$0xff] }
  0xbe   : > { %v534_v45 = vpop.permute.xlu0 %533  ;;  %v419_v41 = vrot.slane %v2005_v35, %v1860_v18 }
  0xbf   : > { %v646_v47 = vadd.f32 %v638_v44, %v558_v11  ;;  %893 = vperm.xlu1 %1559, %v1779_v7   ;;  %v1957_v15 = vadd.f32 %v637_v30, %v557_v31  ;;  %v329_v11 = vsub.f32 %v315_v63, %v1964_v50  ;;  %v2012_v44 = vld [vmem:[%s1855_s16 + $0x30] sm:$0xff]  ;;  %s1590_s16 = scalar_lea.vmem %s2270_s12, 1024 }
  0xc0   : > { %v319_v9 = vrot.slane %v2012_v44, %v1863_v19  ;;  %v415_v52 = vrot.slane %v2012_v44, %v1860_v18  ;;  %p1591_p11 = scmp.ne.s32.totalorder %s2270_s12, %s1590_s16  ;;  %p1598_p1 = scmp.lt.s32.totalorder %s1596_s19, %s1590_s16 }
  0xc1   : > { %v1961_v48 = vpop.permute.xlu1 %693 }
  0xc2   : > { %p1592_p12 = pnand %p1591_p11, %p1739_p5  ;;  %p1599_p2 = por %p1598_p1, %p1597_p0 }
  0xc3   : > { %1560 = vset.pattern.permute.xlu1 %v1659_v13  ;;  %v1970_v53 = vpop.permute.xlu0 %605 }
  0xc4   : > { %973 = vperm.xlu1 %1560, %v1775_v6   ;;  %v425_v6 = vsub.f32 %v411_v56, %v1964_v50  ;;  %v330_v56 = vsub.f32 %v319_v9, %v2012_v44  ;;  %p1593_p13 = pneg %p1592_p12 }
  0xc5   : > { %v702_v57 = vpop.permute.xlu1 %701 }
  0xc6   : > { %v726_v58 = vmul.f32 %v702_v57, %v686_v51  ;;  %v465_v16 = vmul.f32 %v1929_v5, %v425_v6  ;;  %v378_v63 = vmul.f32 %v1907_v49, %v330_v56  ;;  %v503_v49 = vrot.slane %v2012_v44, %v1889_v36  ;;  %p1600_p3 = pnand %p1599_p2, %p1593_p13 }
  0xc7   : > { %v618_v62 = vpop.permute.xlu0 %617 }
  0xc8   : > { %v1982_v13 = vadd.f32 %v726_v58, %v646_v47  ;;  %v639_v0 = vmul.f32 %v618_v62, %v599_v54  ;;  %981 = vperm.xlu1 %1560, %v1779_v7   ;;  %v407_v7 = vrot.slane %v1978_v60, %v1860_v18  ;;  %v499_v18 = vrot.slane %v1964_v50, %v1889_v36 }
  0xc9   : > { %v706_v1 = vpop.permute.xlu1 %705 }
  0xca   : > { %v647_v3 = vadd.f32 %v639_v0, %v559_v26  ;;  %v727_v4 = vmul.f32 %v706_v1, %v687_v59  ;;  %v512_v26 = vsub.f32 %v495_v12, %v1978_v60  ;;  %v424_v27 = vsub.f32 %v407_v7, %v1978_v60 }
  0xcb   : > { %v622_v37 = vpop.permute.xlu0 %621  ;;  %v426_v59 = vsub.f32 %v415_v52, %v2012_v44 }
  0xcc   : > { %v1991_v14 = vadd.f32 %v727_v4, %v647_v3  ;;  %985 = vperm.xlu1 %1560, %v1791_v10   ;;  %v376_v10 = vmul.f32 %v1899_v42, %v328_v21  ;;  %v552_v34 = vmul.f32 %v534_v45, %v512_v26  ;;  %v640_v39 = vmul.f32 %v622_v37, %v600_v29 }
  0xcd   : > { %v323_v42 = vrot.slane %v2005_v35, %v1863_v19  ;;  %v427_v45 = vsub.f32 %v419_v41, %v2005_v35  ;;  %v513_v4 = vsub.f32 %v499_v18, %v1964_v50  ;;  %v567_v26 = vrot.slane %v1866_v20, %v1932_v8 }
  0xce   : > { %v360_v24 = vpop.permute.xlu1 %359 }
  0xcf   : > { %v377_v25 = vmul.f32 %v360_v24, %v329_v11  ;;  %v331_v51 = vsub.f32 %v323_v42, %v2005_v35  ;;  %v467_v54 = vmul.f32 %v1939_v23, %v427_v45  ;;  %v514_v24 = vsub.f32 %v503_v49, %v2012_v44 }
  0xd0   : > { %v962_v6 = vpop.permute.xlu0 %961  ;;  %v2071_v42 = vsub.s32 7, %v1848_v17 }
  0xd1   : > { %v473_v28 = vadd.f32 %v465_v16, %v377_v25 }
  0xd3   : > { %v446_v33 = vpop.permute.xlu1 %445 }
  0xd4   : > { %v464_v5 = vmul.f32 %v446_v33, %v424_v27  ;;  %v2032_v3 = vpop.permute.xlu0 %965  ;;  %v659_v27 = vrot.slane %v1915_v55, %v1952_v43  ;;  %v2056_v33 = vsub.s32 6, %v1848_v17 }
  0xd6   : > { %v472_v40 = vadd.f32 %v464_v5, %v376_v10  ;;  %v596_v5 = vsub.f32 %v567_v26, %v1866_v20  ;;  %v685_v37 = vsub.f32 %v659_v27, %v1915_v55  ;;  %v835_v9 = vrot.slane %v1915_v55, %v2056_v33 }
  0xd8   : > { %v560_v30 = vadd.f32 %v552_v34, %v472_v40  ;;  %v2009_v31 = vpop.permute.xlu1 %781  ;;  %v636_v52 = vmul.f32 %v1970_v53, %v596_v5 }
  0xd9   : > { %v698_v11 = vpop.permute.xlu0 %697 }
  0xda   : > { %v2014_v46 = vadd.f32 %v640_v39, %v560_v30  ;;  %v655_v30 = vrot.slane %v1866_v20, %v1952_v43 }
  0xdc   : > { %v786_v47 = vpop.permute.xlu1 %785 }
  0xdd   : > { %v2043_v21 = vpop.permute.xlu0 %709 }
  0xe1   : > { %v370_v57 = vpop.permute.xlu1 %369  ;;  %v2046_v25 = vpop.permute.xlu0 %721 }
  0xe2   : > { %v379_v58 = vmul.f32 %v370_v57, %v331_v51  ;;  %v831_v51 = vrot.slane %v1866_v20, %v2056_v33 }
  0xe4   : > { %v2027_v62 = vadd.f32 %v467_v54, %v379_v58  ;;  %v725_v54 = vmul.f32 %v698_v11, %v685_v37  ;;  %v684_v58 = vsub.f32 %v655_v30, %v1866_v20  ;;  %v1582_v11 = vld [vmem:[%s2320_s2] sm:$0xff]   ;;  %v1584_v37 = vld [vmem:[%s2320_s2 + $0x10] sm:$0xff]  }
  0xe5   : > { %1447 = vmatprep.subr.bf16.mxu0 %v1582_v11 }
  0xe6   : > { %v454_v0 = vpop.permute.xlu1 %453  ;;  %v2066_v41 = vpop.permute.xlu0 %801  ;;  %v733_v53 = vadd.f32 %v725_v54, %v1957_v15  ;;  %1448 = vmatpush3.bf16.msra.mxu0 %v1582_v11 }
  0xe7   : > { %v466_v19 = vmul.f32 %v454_v0, %v426_v59 }
  0xe9   : > { %v474_v1 = vadd.f32 %v466_v19, %v378_v63  ;;  %v861_v63 = vsub.f32 %v835_v9, %v1915_v55  ;;  %v860_v19 = vsub.f32 %v831_v51, %v1866_v20 }
  0xeb   : > { %v2030_v2 = vpop.permute.xlu1 %789  ;;  %v874_v0 = vpop.permute.xlu0 %873 }
  0xef   : > { %v2036_v23 = vpop.permute.xlu1 %793 }
  0xf4   : > { %v538_v12 = vpop.permute.xlu1 %537 }
  0xf5   : > { %v553_v7 = vmul.f32 %v538_v12, %v513_v4  ;;  %v919_v4 = vrot.slane %v1866_v20, %v2071_v42  ;;  %v724_v12 = vmul.f32 %v1961_v48, %v684_v58 }
  0xf7   : > { %v2039_v16 = vadd.f32 %v553_v7, %v473_v28  ;;  %v2053_v28 = vsub.s32 5, %v1848_v17  ;;  %v923_v17 = vrot.slane %v1915_v55, %v2071_v42  ;;  %v948_v27 = vsub.f32 %v919_v4, %v1866_v20 }
  0xf9   : > { %v870_v22 = vpop.permute.xlu1 %869  ;;  %v747_v39 = vrot.slane %v1915_v55, %v2053_v28  ;;  %v743_v45 = vrot.slane %v1866_v20, %v2053_v28  ;;  %v949_v7 = vsub.f32 %v923_v17, %v1915_v55  ;;  %v751_v5 = vrot.slane %v1892_v38, %v2053_v28 }
  0xfb   : > { %v773_v56 = vsub.f32 %v747_v39, %v1915_v55  ;;  %v772_v59 = vsub.f32 %v743_v45, %v1866_v20  ;;  %v774_v9 = vsub.f32 %v751_v5, %v1892_v38 }
  0xfd   : > { %v813_v18 = vmul.f32 %v786_v47, %v773_v56  ;;  %v812_v49 = vmul.f32 %v2009_v31, %v772_v59  ;;  %v900_v47 = vmul.f32 %v870_v22, %v860_v19  ;;  %v1583_v31 = vld [vmem:[%s2320_s2 + $0x8] sm:$0xff]   ;;  %v755_v22 = vrot.slane %v1880_v32, %v2053_v28 }
  0xfe   : > { %v542_v10 = vpop.permute.xlu1 %541  ;;  %1449 = vmatprep.subr.bf16.mxu0 %v1583_v31  ;;  %v927_v56 = vrot.slane %v1892_v38, %v2071_v42  ;;  %v814_v19 = vmul.f32 %v2030_v2, %v774_v9  ;;  %v759_v9 = vrot.slane %v1978_v60, %v2053_v28 }
  0xff   : > { %v554_v29 = vmul.f32 %v542_v10, %v514_v24  ;;  %v901_v24 = vmul.f32 %v874_v0, %v861_v63  ;;  %v821_v15 = vadd.f32 %v813_v18, %v733_v53  ;;  %v989_v10 = vmul.f32 %v962_v6, %v949_v7  ;;  %1450 = vmatpush3.bf16.msra.mxu0 %v1583_v31  ;;  %v878_v0 = vpop.permute.xlu0 %877  ;;  %v1585_v18 = vld [vmem:[%s2320_s2 + $0x18] sm:$0xff]  }
 0x100   : > { %v839_v6 = vrot.slane %v1892_v38, %v2056_v33  ;;  %1451 = vmatprep.subr.bf16.mxu0 %v1584_v37  ;;  %v775_v58 = vsub.f32 %v755_v22, %v1880_v32  ;;  %v931_v53 = vrot.slane %v1880_v32, %v2071_v42  ;;  %v950_v4 = vsub.f32 %v927_v56, %v1892_v38 }
 0x101   : > { %v2058_v34 = vadd.f32 %v554_v29, %v474_v1  ;;  %v644_v1 = vadd.f32 %v636_v52, %v1921_v61  ;;  %v909_v48 = vadd.f32 %v901_v24, %v821_v15  ;;  %v843_v52 = vrot.slane %v1880_v32, %v2056_v33 }
 0x102   : > { %v2064_v40 = vpop.permute.xlu1 %545  ;;  %v862_v17 = vsub.f32 %v839_v6, %v1892_v38  ;;  %v815_v11 = vmul.f32 %v2036_v23, %v775_v58  ;;  %v822_v2 = vadd.f32 %v814_v19, %v1982_v13  ;;  %v951_v24 = vsub.f32 %v931_v53, %v1880_v32 }
 0x103   : > { %v732_v61 = vadd.f32 %v724_v12, %v644_v1  ;;  %v997_v51 = vadd.f32 %v989_v10, %v909_v48  ;;  %1452 = vmatpush3.bf16.msra.mxu0 %v1584_v37  ;;  %v863_v1 = vsub.f32 %v843_v52, %v1880_v32  ;;  %v763_v6 = vrot.slane %v1964_v50, %v2053_v28  ;;  %v886_v52 = vpop.permute.xlu0 %885 }
 0x104   : > { %v902_v12 = vmul.f32 %v878_v0, %v862_v17  ;;  %1453 = vmatprep.subr.bf16.mxu0 %v1585_v18  ;;  %v823_v15 = vadd.f32 %v815_v11, %v1991_v14  ;;  %v851_v17 = vrot.slane %v1964_v50, %v2056_v33  ;;  %v683_v53 = vrot.slane %v2005_v35, %v1952_v43 }
 0x105   : > { %v820_v29 = vadd.f32 %v812_v49, %v732_v61  ;;  %v990_v61 = vmul.f32 %v2032_v3, %v950_v4  ;;  %v675_v3 = vrot.slane %v1964_v50, %v1952_v43  ;;  %v679_v4 = vrot.slane %v2012_v44, %v1952_v43 }
 0x107   : > { %v882_v57 = vpop.permute.xlu1 %881  ;;  %v908_v30 = vadd.f32 %v900_v47, %v820_v29  ;;  %1454 = vmatpush3.bf16.msra.mxu0 %v1585_v18  ;;  %v910_v47 = vadd.f32 %v902_v12, %v822_v2  ;;  %v591_v18 = vrot.slane %v2012_v44, %v1932_v8  ;;  %v898_v11 = vpop.permute.xlu0 %897 }
 0x108   : > { %v903_v49 = vmul.f32 %v882_v57, %v863_v1  ;;  %v587_v57 = vrot.slane %v1964_v50, %v1932_v8  ;;  %v776_v1 = vsub.f32 %v759_v9, %v1978_v60 }
 0x109   : > { %v998_v5 = vadd.f32 %v990_v61, %v910_v47  ;;  %v939_v61 = vrot.slane %v1964_v50, %v2071_v42  ;;  %v935_v47 = vrot.slane %v1978_v60, %v2071_v42 }
 0x10a   : > { %v911_v10 = vadd.f32 %v903_v49, %v823_v15  ;;  %v601_v22 = vsub.f32 %v587_v57, %v1964_v50 }
 0x10c   : > { %v2097_v26 = vpop.permute.xlu1 %625 }
 0x10d   : > { %v641_v58 = vmul.f32 %v2097_v26, %v601_v22  ;;  %v855_v22 = vrot.slane %v2012_v44, %v2056_v33 }
 0x10f   : > { %v649_v2 = vadd.f32 %v641_v58, %v2039_v16 }
 0x111   : > { %v958_v39 = vpop.permute.xlu1 %957 }
 0x112   : > { %v988_v45 = vmul.f32 %v958_v39, %v948_v27  ;;  %v671_v39 = vrot.slane %v1978_v60, %v1952_v43 }
 0x114   : > { %v996_v54 = vadd.f32 %v988_v45, %v908_v30  ;;  %v507_v30 = vrot.slane %v2005_v35, %v1889_v36  ;;  %v689_v45 = vsub.f32 %v675_v3, %v1964_v50  ;;  %v688_v56 = vsub.f32 %v671_v39, %v1978_v60  ;;  %v978_v39 = vpop.permute.xlu0 %977 }
 0x115   : > { %v847_v36 = vrot.slane %v1978_v60, %v2056_v33  ;;  %v953_v3 = vsub.f32 %v939_v61, %v1964_v50 }
 0x116   : > { %v2119_v59 = vpop.permute.xlu1 %629  ;;  %v1562_v63 = vpack.i.bf16 %v997_v51, %v996_v54  ;;  %v595_v51 = vrot.slane %v2005_v35, %v1932_v8  ;;  %v515_v0 = vsub.f32 %v507_v30, %v2005_v35  ;;  %v728_v12 = vmul.f32 %v2043_v21, %v688_v56 }
 0x117   : > { %v864_v15 = vsub.f32 %v847_v36, %v1978_v60  ;;  %v771_v8 = vrot.slane %v2005_v35, %v2053_v28  ;;  %v993_v36 = vmul.f32 %v978_v39, %v953_v3 }
 0x118   : > { %1563 = vrot.lane.b32.xlu0 %v1562_v63, %s1662_s29  ;;  %v777_v63 = vsub.f32 %v763_v6, %v1964_v50  ;;  %v603_v26 = vsub.f32 %v595_v51, %v2005_v35  ;;  %v555_v21 = vmul.f32 %v2064_v40, %v515_v0  ;;  %v952_v6 = vsub.f32 %v935_v47, %v1978_v60 }
 0x119   : > { %v779_v40 = vsub.f32 %v771_v8, %v2005_v35  ;;  %v943_v51 = vrot.slane %v2012_v44, %v2071_v42 }
 0x11a   : > { %v634_v7 = vpop.permute.xlu1 %633  ;;  %v817_v43 = vmul.f32 %v2066_v41, %v777_v63  ;;  %v866_v63 = vsub.f32 %v855_v22, %v2012_v44 }
 0x11f   : > { %v970_v27 = vpop.permute.xlu1 %969 }
 0x120   : > { %v991_v29 = vmul.f32 %v970_v27, %v951_v24  ;;  %v865_v24 = vsub.f32 %v851_v17, %v1964_v50 }
 0x122   : > { %v999_v48 = vadd.f32 %v991_v29, %v911_v10  ;;  %v691_v10 = vsub.f32 %v683_v53, %v2005_v35  ;;  %v602_v29 = vsub.f32 %v591_v18, %v2012_v44 }
 0x124   : > { %v714_v23 = vpop.permute.xlu1 %713  ;;  %v1567_v31 = vpack.i.bf16 %v999_v48, %v998_v5  ;;  %v690_v5 = vsub.f32 %v679_v4, %v2012_v44  ;;  %v767_v48 = vrot.slane %v2012_v44, %v2053_v28  ;;  %v563_v28 = vadd.f32 %v555_v21, %v2027_v62 }
 0x125   : > { %v729_v19 = vmul.f32 %v714_v23, %v689_v45  ;;  %v736_v23 = vadd.f32 %v728_v12, %v2014_v46  ;;  %v904_v46 = vmul.f32 %v886_v52, %v864_v15  ;;  %v642_v45 = vmul.f32 %v2119_v59, %v602_v29 }
 0x126   : > { %1568 = vrot.lane.b32.xlu1 %v1567_v31, %s1662_s29  ;;  %v643_v31 = vmul.f32 %v634_v7, %v603_v26  ;;  %v778_v9 = vsub.f32 %v767_v48, %v2012_v44  ;;  %v731_v56 = vmul.f32 %v2046_v25, %v691_v10  ;;  %v947_v52 = vrot.slane %v2005_v35, %v2071_v42 }
 0x127   : > { %v737_v27 = vadd.f32 %v729_v19, %v649_v2  ;;  %v650_v53 = vadd.f32 %v642_v45, %v2058_v34  ;;  %v954_v25 = vsub.f32 %v943_v51, %v2012_v44  ;;  %v1586_v34 = vld [vmem:[%s2322_s4] sm:$0xff]  }
 0x128   : > { %v2136_v37 = vpop.permute.xlu1 %717  ;;  %v651_v58 = vadd.f32 %v643_v31, %v563_v28  ;;  %1463 = vmatprep.subr.bf16.mxu1 %v1586_v34 }
 0x129   : > { %v825_v7 = vadd.f32 %v817_v43, %v737_v27  ;;  %v730_v59 = vmul.f32 %v2136_v37, %v690_v5  ;;  %1464 = vmatpush3.bf16.msra.mxu1 %v1586_v34  ;;  %v1416_v34 = vld [vmem:[%s2323_s5] ss:$0 sm:$0xff] }
 0x12a   : > { %v739_v26 = vadd.f32 %v731_v56, %v651_v58 }
 0x12b   : > { %v738_v61 = vadd.f32 %v730_v59, %v650_v53 }
 0x12d   : > { %v798_v13 = vpop.permute.xlu1 %797 }
 0x12e   : > { %v816_v16 = vmul.f32 %v798_v13, %v776_v1  ;;  %v859_v13 = vrot.slane %v2005_v35, %v2056_v33 }
 0x130   : > { %v824_v30 = vadd.f32 %v816_v16, %v736_v23  ;;  %v867_v33 = vsub.f32 %v859_v13, %v2005_v35 }
 0x131   : > { %v2142_v14 = vpop.permute.xlu1 %805 }
 0x132   : > { %v912_v0 = vadd.f32 %v904_v46, %v824_v30  ;;  %v818_v18 = vmul.f32 %v2142_v14, %v778_v9  ;;  %v907_v2 = vmul.f32 %v898_v11, %v867_v33  ;;  %v1587_v14 = vld [vmem:[%s2322_s4 + $0x8] sm:$0xff]  }
 0x133   : > { %1465 = vmatprep.subr.bf16.mxu1 %v1587_v14 }
 0x134   : > { %v826_v8 = vadd.f32 %v818_v18, %v738_v61  ;;  %1466 = vmatpush3.bf16.msra.mxu1 %v1587_v14 }
 0x135   : > { %v810_v54 = vpop.permute.xlu1 %809 }
 0x136   : > { %v819_v19 = vmul.f32 %v810_v54, %v779_v40 }
 0x138   : > { %v827_v42 = vadd.f32 %v819_v19, %v739_v26 }
 0x13a   : > { %v890_v49 = vpop.permute.xlu1 %889  ;;  %v915_v47 = vadd.f32 %v907_v2, %v827_v42 }
 0x13b   : > { %v905_v57 = vmul.f32 %v890_v49, %v865_v24  ;;  %v955_v24 = vsub.f32 %v947_v52, %v2005_v35 }
 0x13d   : > { %v913_v17 = vadd.f32 %v905_v57, %v825_v7 }
 0x13e   : > { %v894_v41 = vpop.permute.xlu1 %893 }
 0x13f   : > { %v1001_v4 = vadd.f32 %v993_v36, %v913_v17  ;;  %v906_v15 = vmul.f32 %v894_v41, %v866_v63 }
 0x141   : > { %v914_v43 = vadd.f32 %v906_v15, %v826_v8 }
 0x143   : > { %v974_v62 = vpop.permute.xlu1 %973 }
 0x144   : > { %v992_v1 = vmul.f32 %v974_v62, %v952_v6 }
 0x146   : > { %v1000_v12 = vadd.f32 %v992_v1, %v912_v0 }
 0x147   : > { %v982_v49 = vpop.permute.xlu1 %981 }
 0x148   : > { %v1572_v37 = vpack.i.bf16 %v1001_v4, %v1000_v12  ;;  %v994_v54 = vmul.f32 %v982_v49, %v954_v25 }
 0x14a   : > { %1573 = vrot.lane.b32.xlu0 %v1572_v37, %s1662_s29  ;;  %v1002_v27 = vadd.f32 %v994_v54, %v914_v43 }
 0x14b   : > { %v986_v11 = vpop.permute.xlu1 %985 }
 0x14c   : > { %v995_v21 = vmul.f32 %v986_v11, %v955_v24 }
 0x14e   : > { %v1003_v16 = vadd.f32 %v995_v21, %v915_v47 }
 0x150   : > { %v1577_v10 = vpack.i.bf16 %v1003_v16, %v1002_v27 }
 0x152   : > { %1578 = vrot.lane.b32.xlu1 %v1577_v10, %s1662_s29 }
 0x18a   : > { %v1564_v29 = vpop.permute.xlu0 %1563 }
 0x18b   : > { %v1566_v5 = vunpack.i.h.bf16 %v1564_v29  ;;  %v1565_v48 = vunpack.i.l.bf16 %v1564_v29 }
 0x18d   : > { %v1037_v23 = vsel %vm1036_vm0, %v1866_v20, %v1565_v48  ;;  %v1038_v31 = vsel %vm1036_vm0, %v1915_v55, %v1566_v5 }
 0x18e   : > { %v1045_v57 = vpack.c.bf16 %v1038_v31, %v1037_v23 }
 0x190   : > { %1455 = vmatprep.mubr.msk.bf16.mxu0 %vm1088_vm1, %v1045_v57 }
 0x198   : > { %v1569_v3 = vpop.permute.xlu1 %1568 }
 0x199   : > { %v1571_v41 = vunpack.i.h.bf16 %v1569_v3  ;;  %v1570_v40 = vunpack.i.l.bf16 %v1569_v3 }
 0x19b   : > { %v1040_v13 = vsel %vm1036_vm0, %v1880_v32, %v1571_v41  ;;  %v1039_v39 = vsel %vm1036_vm0, %v1892_v38, %v1570_v40 }
 0x19c   : > { %v1046_v22 = vpack.c.bf16 %v1040_v13, %v1039_v39 }
 0x19e   : > { %1456 = vmatmul.mubr.msk.bf16.vlgmr.msra.gmra.mrb[0].mxu0 %vm1088_vm1, %v1046_v22 }
 0x1bc   : > { %v1574_v20 = vpop.permute.xlu0 %1573 }
 0x1bd   : > { %v1576_v6 = vunpack.i.h.bf16 %v1574_v20  ;;  %v1575_v28 = vunpack.i.l.bf16 %v1574_v20 }
 0x1bf   : > { %v1042_v55 = vsel %vm1036_vm0, %v1964_v50, %v1576_v6  ;;  %v1041_v30 = vsel %vm1036_vm0, %v1978_v60, %v1575_v28  ;;  %v1588_v50 = vld [vmem:[%s2322_s4 + $0x10] sm:$0xff]   ;;  %v1589_v60 = vld [vmem:[%s2322_s4 + $0x18] sm:$0xff]  }
 0x1c0   : > { %v1047_v46 = vpack.c.bf16 %v1042_v55, %v1041_v30  ;;  %1467 = vmatprep.subr.bf16.mxu1 %v1588_v50 }
 0x1c1   : > { %1468 = vmatpush3.bf16.msra.mxu1 %v1588_v50 }
 0x1c2   : > { %1459 = vmatprep.mubr.msk.bf16.mxu0 %vm1088_vm1, %v1047_v46  ;;  %1469 = vmatprep.subr.bf16.mxu1 %v1589_v60 }
 0x1c4   : > { %v1579_v7 = vpop.permute.xlu1 %1578 }
 0x1c5   : > { %v1581_v32 = vunpack.i.h.bf16 %v1579_v7  ;;  %v1580_v45 = vunpack.i.l.bf16 %v1579_v7  ;;  %1470 = vmatpush3.bf16.msra.mxu1 %v1589_v60 }
 0x1c7   : > { %v1044_v38 = vsel %vm1036_vm0, %v2005_v35, %v1581_v32  ;;  %v1043_v9 = vsel %vm1036_vm0, %v2012_v44, %v1580_v45  ;;  %v1407_v35 = vld [vmem:[%s2321_s3] ss:$0 sm:$0xff] }
 0x1c8   : > { %v1048_v51 = vpack.c.bf16 %v1044_v38, %v1043_v9 }
 0x1ca   : > { %1460 = vmatmul.mubr.msk.bf16.gmra.mrb[4].mxu0 %vm1088_vm1, %v1048_v51 }
 0x271   : > { %v1457_v44 = vpop.f32.mrb[0].mxu0 }
 0x272   : > { %v1144_v56 = vadd.f32 %v1457_v44, %v1407_v35  ;;  %v1135_v58 = vpop.f32.mrb[1].mxu0 }
 0x273   : > { %v1136_v17 = vadd.f32 %v1407_v35, %v1135_v58  ;;  %v1458_v36 = vpop.f32.mrb[2].mxu0 }
 0x274   : > { %v1147_v33 = vadd.f32 %v1458_v36, %v1407_v35  ;;  %v1138_v63 = vpop.f32.mrb[3].mxu0  ;;  %v1168_v52 = vmax.f32 %v1144_v56, 0.0 }
 0x275   : > { %v1139_v62 = vadd.f32 %v1407_v35, %v1138_v63  ;;  %v1166_v0 = vmax.f32 %v1136_v17, 0.0 }
 0x276   : > { %v1169_v59 = vmax.f32 %v1147_v33, 0.0 }
 0x277   : > { %v1167_v19 = vmax.f32 %v1139_v62, 0.0 }
 0x278   : > { %v1175_v1 = vpack.c.bf16 %v1169_v59, %v1168_v52 }
 0x279   : > { %v1174_v53 = vpack.c.bf16 %v1167_v19, %v1166_v0 }
 0x27b   : > { %1471 = vmatprep.mubr.msk.bf16.mxu1 %vm1088_vm1, %v1174_v53 }
 0x27c   : > { %1472 = vmatmul.mubr.msk.bf16.vlgmr.msra.gmra.mrb[0].mxu1 %vm1088_vm1, %v1175_v1 }
 0x29d   : > { %v1461_v25 = vpop.f32.mrb[4].mxu0 }
 0x29e   : > { %v1160_v18 = vadd.f32 %v1461_v25, %v1407_v35  ;;  %v1151_v26 = vpop.f32.mrb[5].mxu0 }
 0x29f   : > { %v1152_v4 = vadd.f32 %v1407_v35, %v1151_v26  ;;  %v1462_v12 = vpop.f32.mrb[6].mxu0 }
 0x2a0   : > { %v1163_v2 = vadd.f32 %v1462_v12, %v1407_v35  ;;  %v1154_v49 = vpop.f32.mrb[7].mxu0  ;;  %v1172_v61 = vmax.f32 %v1160_v18, 0.0 }
 0x2a1   : > { %v1155_v24 = vadd.f32 %v1407_v35, %v1154_v49  ;;  %v1170_v15 = vmax.f32 %v1152_v4, 0.0 }
 0x2a2   : > { %v1173_v42 = vmax.f32 %v1163_v2, 0.0 }
 0x2a3   : > { %v1171_v37 = vmax.f32 %v1155_v24, 0.0 }
 0x2a4   : > { %v1177_v8 = vpack.c.bf16 %v1173_v42, %v1172_v61 }
 0x2a5   : > { %v1176_v54 = vpack.c.bf16 %v1171_v37, %v1170_v15 }
 0x2a7   : > { %1475 = vmatprep.mubr.msk.bf16.mxu1 %vm1088_vm1, %v1176_v54 }
 0x2a8   : > { %1476 = vmatmul.mubr.msk.bf16.gmra.mrb[4].mxu1 %vm1088_vm1, %v1177_v8 }
 0x34f   : > { %v1473_v14 = vpop.f32.mrb[0].mxu1 }
 0x350   : > { %v1272_v11 = vadd.f32 %v1473_v14, %v1416_v34  ;;  %v1263_v47 = vpop.f32.mrb[1].mxu1 }
 0x351   : > { %v1264_v43 = vadd.f32 %v1416_v34, %v1263_v47  ;;  %v1474_v21 = vpop.f32.mrb[2].mxu1 }
 0x352   : > { %v1296_v27 = vmax.f32 %v1272_v11, 0.0  ;;  %v1275_v16 = vadd.f32 %v1474_v21, %v1416_v34  ;;  %v1266_v10 = vpop.f32.mrb[3].mxu1 }
 0x353   : > { %v1294_v29 = vmax.f32 %v1264_v43, 0.0  ;;  %v1267_v5 = vadd.f32 %v1416_v34, %v1266_v10 }
 0x354   : > { %1304 = vst.msk [vmem:[%s261_s10 + $0x10] sm:$0xff] %vm1036_vm0, %v1296_v27  ;;  %v1297_v48 = vmax.f32 %v1275_v16, 0.0 }
 0x355   : > { %1302 = vst.msk [vmem:[%s261_s10] sm:$0xff] %vm1036_vm0, %v1294_v29  ;;  %v1295_v23 = vmax.f32 %v1267_v5, 0.0 }
 0x356   : > { %1305 = vst.msk [vmem:[%s261_s10 + $0x18] sm:$0xff] %vm1036_vm0, %v1297_v48 }
 0x357   : > { %1303 = vst.msk [vmem:[%s261_s10 + $0x8] sm:$0xff] %vm1036_vm0, %v1295_v23 }
 0x37b   : > { %v1477_v31 = vpop.f32.mrb[4].mxu1 }
 0x37c   : > { %v1288_v57 = vadd.f32 %v1477_v31, %v1416_v34  ;;  %v1279_v3 = vpop.f32.mrb[5].mxu1 }
 0x37d   : > { %v1280_v41 = vadd.f32 %v1416_v34, %v1279_v3  ;;  %v1478_v40 = vpop.f32.mrb[6].mxu1 }
 0x37e   : > { %v1300_v13 = vmax.f32 %v1288_v57, 0.0  ;;  %v1291_v39 = vadd.f32 %v1478_v40, %v1416_v34  ;;  %v1282_v22 = vpop.f32.mrb[7].mxu1 }
 0x37f   : > { %v1298_v20 = vmax.f32 %v1280_v41, 0.0  ;;  %v1283_v6 = vadd.f32 %v1416_v34, %v1282_v22 }
 0x380   : > { %1308 = vst.msk [vmem:[%s261_s10 + $0x30] sm:$0xff] %vm1036_vm0, %v1300_v13  ;;  %v1301_v28 = vmax.f32 %v1291_v39, 0.0 }
 0x381   : > { %1306 = vst.msk [vmem:[%s261_s10 + $0x20] sm:$0xff] %vm1036_vm0, %v1298_v20  ;;  %v1299_v55 = vmax.f32 %v1283_v6, 0.0 }
 0x382   : > { %1309 = vst.msk [vmem:[%s261_s10 + $0x38] sm:$0xff] %vm1036_vm0, %v1301_v28 }
 0x383   : > { %1307 = vst.msk [vmem:[%s261_s10 + $0x28] sm:$0xff] %vm1036_vm0, %v1299_v55 }
 0x384   : > { %1603 = shalt.err (!%p1600_p3)
}
 0x385   : > { %s1604_s20 = scalar_lea.hbm %s2268_s15, 1024  ;;  %s1608_s29 = scalar_lea.hbm %s2324_s6, 2048 }
 0x386   : > { %p1605_p4 = scmp.ne.s32.totalorder %s2268_s15, %s1604_s20  ;;  %p1609_p9 = scmp.lt.u32.totalorder %s2268_s15, %s2324_s6 }
 0x387   : > { %p1610_p10 = scmp.lt.u32.totalorder %s1608_s29, %s1604_s20  ;;  %p1612_p12 = scmp.lt.u32.totalorder %s1604_s20, %s2268_s15 }
 0x388   : > { %p1606_p7 = pnand %p1605_p4, %p1739_p5 }
 0x389   : > { %p1611_p11 = por %p1610_p10, %p1609_p9 }
 0x38a   : > { %p1607_p8 = pneg %p1606_p7 }
 0x38b   : > { %p1613_p13 = por %p1612_p12, %p1611_p11 }
 0x38d   : > { %p1614_p0 = pnand %p1613_p13, %p1607_p8 }
 0x38f   : > { %1617 = shalt.err (!%p1614_p0)
}
 0x390   : > { %s1664_s11 = smov 128   ;;  %s1665_s13 = smov 8  }
 0x391   : > { %1479 = dma.vmem_to_hbm [thread:$0]  (%p1739_p5), %s2270_s12, 1024, %s2268_s15, %s2277_s25, %s1664_s11, %s1664_s11, %s1665_s13  }
 0x392 PF: > { %p1485_p1 = scmp.ge.s32.totalorder %s1652_s24, 2  ;;  %s1339_s14 = sand.u32 1, %s1640_s21  }
 0x393   : > { %s1340_s16 = scalar_lea.sflag [#allocation3], %s1339_s14 }
 0x394   : > { %p1482_p2 = pnand %p1485_p1, %p1743_p6 }
 0x396   : > { %1635 = dma.done.wait (!%p1482_p2), %s1340_s16, 1024  }
 0x397   : > { %1637 = vsyncadd (!%p1482_p2), %s1340_s16, 4294966272  ;;  %p16_p3 = scmp.ge.s32.totalorder %s1726_s27, 4   ;;  %s2327_s21 = smov %s1644_s22 }
 0x398   : > { %s2328_s22 = smov %s1648_s23  ;;  %s2329_s23 = smov %s1737_s30 }
 0x399   : > { %s2330_s24 = smov %s1726_s27  ;;  %18 = sbr.rel (!%p16_p3) target bundleno = 3 (0x3), region = 82 }
 0x3a0   :  { %1345 = vsyncpa [#allocation3], 1 }
 0x3a1   :  { %1347 = vsyncpa [#allocation3 + $0x1], 1 }

</bundles_post_ra>
